<compile_context>
chip_gen: v7x
topology: tpu7x:2x2x1
jax: 0.10.0
libtpu: 0.0.40
codegen_flags: <defaults>
</compile_context>

<pallas_src>
import functools

import jax
import jax.numpy as jnp
from jax.experimental import pallas as pl
from jax.experimental.pallas import tpu as pltpu


def _make_divisible(v, divisor, min_value=None):
    if min_value is None:
        min_value = divisor
    new_v = max(min_value, int(v + divisor / 2) // divisor * divisor)
    if new_v < 0.9 * v:
        new_v += divisor
    return new_v


def _chip_config():
    """Per-generation block-size target, scoped-VMEM cap, min grid steps."""
    kind = ""
    try:
        kind = jax.devices()[0].device_kind.lower()
    except Exception:
        pass
    if "v7" in kind:
        # 64 MiB physical VMEM, 2 TensorCores: 4*block + weights <= ~44 MiB
        # and >= 2 grid steps per core so each core double-buffers its DMAs.
        return dict(block_bytes=9 << 20, vmem_hard_cap=56 << 20, min_steps=4)
    if "v5 lite" in kind or "v5e" in kind or "v5lite" in kind:
        # 128 MiB physical; the 16 MiB default scoped limit must be raised.
        return dict(block_bytes=10 << 20, vmem_hard_cap=112 << 20, min_steps=1)
    # v6e (128 MiB physical) and unknown chips.
    return dict(block_bytes=14 << 20, vmem_hard_cap=112 << 20, min_steps=1)


def se_kernel(x_ref, w1t_ref, b1_ref, w2t_ref, b2_ref, o_ref, *, inv_hw):
    # x_ref: (TN, C, HW) native dtype; w1t: (C, S); b1: (1, S); w2t: (S, C); b2: (1, C)
    x = x_ref[...]                                                  # (TN, C, HW)

    # adaptive_avg_pool2d(x, 1) == mean over H*W.  The reduction is masked to
    # the logical HW extent, so no lane padding is needed; accumulate in f32.
    pooled = jnp.sum(x, axis=-1, dtype=jnp.float32) * inv_hw        # (TN, C) f32

    # fc1 (1x1 conv == matmul) + bias, ReLU
    s1 = jnp.dot(pooled, w1t_ref[...],
                 preferred_element_type=jnp.float32) + b1_ref[...]   # (TN, S)
    s1 = jnp.maximum(s1, 0.0)

    # fc2 (1x1 conv == matmul) + bias, hardsigmoid = clip(z + 3, 0, 6) / 6
    z = jnp.dot(s1, w2t_ref[...],
                preferred_element_type=jnp.float32) + b2_ref[...]    # (TN, C)
    scale = jnp.clip(z + 3.0, 0.0, 6.0) * (1.0 / 6.0)                # (TN, C) f32

    # Channel-wise rescale in the NATIVE activation dtype (no f32 upcast of
    # the big block).
    o_ref[...] = (scale.astype(x.dtype)[:, :, None] * x).astype(o_ref.dtype)


def squeeze_excitation(x, fc1_w, fc1_b, fc2_w, fc2_b):
    """x: (N, C, H, W); fc1_w: (S, C, 1, 1); fc1_b: (S,); fc2_w: (C, S, 1, 1); fc2_b: (C,)."""
    N, C, H, W = x.shape
    S = fc1_w.shape[0]
    HW = H * W

    cfg = _chip_config()

    # Free (metadata-only) reshape; no padding / extra HBM passes.
    x_flat = x.reshape(N, C, HW)

    # Size TN (images per grid step) from the VMEM footprint of one block.
    # Sublane packing depends on dtype: 8 for 4-byte, 16 for 2-byte, 32 for
    # 1-byte elements; lanes pad HW to a multiple of 128 inside VMEM only.
    itemsize = jnp.dtype(x.dtype).itemsize
    sublane = 32 // max(1, itemsize)
    c_pad = pl.cdiv(C, sublane) * sublane
    hw_pad = pl.cdiv(HW, 128) * 128
    bytes_per_image = int(c_pad) * int(hw_pad) * int(itemsize)

    TN = max(1, int(cfg["block_bytes"]) // bytes_per_image)
    TN = min(TN, N)
    # Keep >= min_steps grid steps (>= 2 per TensorCore on v7x) when N allows.
    eff_steps = min(cfg["min_steps"], N)
    if eff_steps > 1:
        TN = max(1, min(TN, N // eff_steps))

    grid = pl.cdiv(N, TN)

    # Explicit scoped-VMEM budget: x and out blocks are each double-buffered
    # (~4x block), plus small weight/bias blocks; leave ~25% headroom.
    block_vmem = TN * bytes_per_image
    need = 4 * block_vmem + (4 << 20)
    vmem_limit = int(min(cfg["vmem_hard_cap"], max(32 << 20, (need * 5) // 4)))
    # TODO(synk): if a single image ever exceeds the per-chip block budget
    # (huge C*H*W), tile H*W with a two-pass pool/rescale instead.

    w1t = fc1_w.reshape(S, C).T            # (C, S)
    w2t = fc2_w.reshape(C, S).T            # (S, C)
    b1r = fc1_b.reshape(1, S)
    b2r = fc2_b.reshape(1, C)

    kernel = functools.partial(se_kernel, inv_hw=1.0 / HW)

    out = pl.pallas_call(
        kernel,
        out_shape=jax.ShapeDtypeStruct((N, C, HW), x.dtype),
        grid_spec=pltpu.PrefetchScalarGridSpec(
            num_scalar_prefetch=0,
            grid=(grid,),
            in_specs=[
                # Block dims equal to the full (C, HW) extents are legal even
                # when they are not multiples of (8, 128).
                pl.BlockSpec((TN, C, HW), lambda n: (n, 0, 0)),
                # Grid-invariant weights / biases (fetched once).
                pl.BlockSpec((C, S), lambda n: (0, 0)),
                pl.BlockSpec((1, S), lambda n: (0, 0)),
                pl.BlockSpec((S, C), lambda n: (0, 0)),
                pl.BlockSpec((1, C), lambda n: (0, 0)),
            ],
            out_specs=pl.BlockSpec((TN, C, HW), lambda n: (n, 0, 0)),
        ),
        compiler_params=pltpu.CompilerParams(
            dimension_semantics=("parallel",),
            vmem_limit_bytes=vmem_limit),
    )(x_flat, w1t, b1r, w2t, b2r)

    return out.reshape(N, C, H, W)


def _reference(x, fc1_w, fc1_b, fc2_w, fc2_b):
    # Pure-JAX reference mirroring the PyTorch forward.
    N, C, H, W = x.shape
    S = fc1_w.shape[0]
    pooled = jnp.mean(x, axis=(2, 3))                          # (N, C)
    s1 = jax.nn.relu(pooled @ fc1_w.reshape(S, C).T + fc1_b)   # (N, S)
    z = s1 @ fc2_w.reshape(C, S).T + fc2_b                     # (N, C)
    scale = jnp.clip(z + 3.0, 0.0, 6.0) / 6.0
    return scale[:, :, None, None] * x


if __name__ == "__main__":
    # Module config: in_c = 4, squeeze_factor = 4 -> squeeze_c = _make_divisible(1, 8) = 8
    N, C, H, W = 2, 4, 16, 16
    squeeze_c = _make_divisible(C // 4, 8)

    key = jax.random.PRNGKey(0)
    kx, k1w, k1b, k2w, k2b = jax.random.split(key, 5)
    x = jax.random.normal(kx, (N, C, H, W), dtype=jnp.float32)
    fc1_w = 0.1 * jax.random.normal(k1w, (squeeze_c, C, 1, 1), dtype=jnp.float32)
    fc1_b = 0.1 * jax.random.normal(k1b, (squeeze_c,), dtype=jnp.float32)
    fc2_w = 0.1 * jax.random.normal(k2w, (C, squeeze_c, 1, 1), dtype=jnp.float32)
    fc2_b = 0.1 * jax.random.normal(k2b, (C,), dtype=jnp.float32)

    out = squeeze_excitation(x, fc1_w, fc1_b, fc2_w, fc2_b)
    out = jax.block_until_ready(out)

    ref = _reference(x, fc1_w, fc1_b, fc2_w, fc2_b)
    assert out.shape == (N, C, H, W)
    assert jnp.allclose(out, ref, atol=1e-5, rtol=1e-5), "mismatch vs reference"

    print("KERNEL_OK")
</pallas_src>

<mosaic_0001>
module attributes {stable_mosaic.version = 11 : i64} {
  func.func @se_kernel(%arg0: i32, %arg1: memref<2x4x256xf32, #tpu.memory_space<vmem>>, %arg2: memref<4x8xf32, #tpu.memory_space<vmem>>, %arg3: memref<1x8xf32, #tpu.memory_space<vmem>>, %arg4: memref<8x4xf32, #tpu.memory_space<vmem>>, %arg5: memref<1x4xf32, #tpu.memory_space<vmem>>, %arg6: memref<2x4x256xf32, #tpu.memory_space<vmem>>) attributes {dimension_semantics = [#tpu.dimension_semantics<parallel>], iteration_bounds = array<i64: 1>, scalar_prefetch = 0 : i64, scratch_operands = 0 : i64, tpu.core_type = #tpu.core_type<tc>, window_params = [{transform_indices = @transform_0, window_bounds = array<i64: 2, 4, 256>}, {pipeline_mode = #tpu.pipeline_mode<synchronous>, transform_indices = @transform_1, window_bounds = array<i64: 4, 8>}, {pipeline_mode = #tpu.pipeline_mode<synchronous>, transform_indices = @transform_2, window_bounds = array<i64: 1, 8>}, {pipeline_mode = #tpu.pipeline_mode<synchronous>, transform_indices = @transform_3, window_bounds = array<i64: 8, 4>}, {pipeline_mode = #tpu.pipeline_mode<synchronous>, transform_indices = @transform_4, window_bounds = array<i64: 1, 4>}, {transform_indices = @transform_5, window_bounds = array<i64: 2, 4, 256>}]} {
    %c0 = arith.constant 0 : index
    %c0_0 = arith.constant 0 : index
    %c0_1 = arith.constant 0 : index
    %0 = vector.load %arg1[%c0, %c0_0, %c0_1] : memref<2x4x256xf32, #tpu.memory_space<vmem>>, vector<2x4x256xf32>
    %cst = arith.constant dense<0.000000e+00> : vector<2x4xf32>
    %1 = vector.multi_reduction <add>, %0, %cst [2] : vector<2x4x256xf32> to vector<2x4xf32>
    %cst_2 = arith.constant 3.906250e-03 : f32
    %2 = vector.broadcast %cst_2 : f32 to vector<2x4xf32>
    %3 = arith.mulf %1, %2 : vector<2x4xf32>
    %c0_3 = arith.constant 0 : index
    %c0_4 = arith.constant 0 : index
    %4 = vector.load %arg2[%c0_3, %c0_4] : memref<4x8xf32, #tpu.memory_space<vmem>>, vector<4x8xf32>
    %cst_5 = arith.constant dense<0.000000e+00> : vector<2x8xf32>
    %5 = tpu.matmul %3, %4, %cst_5 {dimension_numbers = #tpu.dot_dimension_numbers<[1], [0], [0], [1], [0, 0, 1, 1], [], []>} : vector<2x4xf32>, vector<4x8xf32>, vector<2x8xf32> -> vector<2x8xf32>
    %c0_6 = arith.constant 0 : index
    %c0_7 = arith.constant 0 : index
    %6 = vector.load %arg3[%c0_6, %c0_7] : memref<1x8xf32, #tpu.memory_space<vmem>>, vector<1x8xf32>
    %7 = vector.broadcast %6 : vector<1x8xf32> to vector<2x8xf32>
    %8 = arith.addf %5, %7 : vector<2x8xf32>
    %cst_8 = arith.constant 0.000000e+00 : f32
    %9 = vector.broadcast %cst_8 : f32 to vector<2x8xf32>
    %10 = arith.maximumf %8, %9 : vector<2x8xf32>
    %c0_9 = arith.constant 0 : index
    %c0_10 = arith.constant 0 : index
    %11 = vector.load %arg4[%c0_9, %c0_10] : memref<8x4xf32, #tpu.memory_space<vmem>>, vector<8x4xf32>
    %cst_11 = arith.constant dense<0.000000e+00> : vector<2x4xf32>
    %12 = tpu.matmul %10, %11, %cst_11 {dimension_numbers = #tpu.dot_dimension_numbers<[1], [0], [0], [1], [0, 0, 1, 1], [], []>} : vector<2x8xf32>, vector<8x4xf32>, vector<2x4xf32> -> vector<2x4xf32>
    %c0_12 = arith.constant 0 : index
    %c0_13 = arith.constant 0 : index
    %13 = vector.load %arg5[%c0_12, %c0_13] : memref<1x4xf32, #tpu.memory_space<vmem>>, vector<1x4xf32>
    %14 = vector.broadcast %13 : vector<1x4xf32> to vector<2x4xf32>
    %15 = arith.addf %12, %14 : vector<2x4xf32>
    %cst_14 = arith.constant 3.000000e+00 : f32
    %16 = vector.broadcast %cst_14 : f32 to vector<2x4xf32>
    %17 = arith.addf %15, %16 : vector<2x4xf32>
    %cst_15 = arith.constant 0.000000e+00 : f32
    %cst_16 = arith.constant 6.000000e+00 : f32
    %18 = vector.broadcast %cst_15 : f32 to vector<2x4xf32>
    %19 = arith.maximumf %18, %17 : vector<2x4xf32>
    %20 = vector.broadcast %cst_16 : f32 to vector<2x4xf32>
    %21 = arith.minimumf %20, %19 : vector<2x4xf32>
    %cst_17 = arith.constant 0.166666672 : f32
    %22 = vector.broadcast %cst_17 : f32 to vector<2x4xf32>
    %23 = arith.mulf %21, %22 : vector<2x4xf32>
    %24 = vector.shape_cast %23 : vector<2x4xf32> to vector<2x4x1xf32>
    %25 = vector.broadcast %24 : vector<2x4x1xf32> to vector<2x4x256xf32>
    %26 = arith.mulf %25, %0 : vector<2x4x256xf32>
    %c0_18 = arith.constant 0 : index
    %c0_19 = arith.constant 0 : index
    %c0_20 = arith.constant 0 : index
    %27 = vector.load %arg6[%c0_18, %c0_19, %c0_20] : memref<2x4x256xf32, #tpu.memory_space<vmem>>, vector<2x4x256xf32>
    tpu.vector_store %arg6[%c0_18, %c0_19, %c0_20], %26 {strides = array<i32>} : memref<2x4x256xf32, #tpu.memory_space<vmem>>, vector<2x4x256xf32>,
    return
  }
  func.func @transform_0(%arg0: i32) -> (i32, i32, i32) {
    %c0_i32 = arith.constant 0 : i32
    %c0_i32_0 = arith.constant 0 : i32
    %c0_i32_1 = arith.constant 0 : i32
    return %arg0, %c0_i32, %c0_i32_0 : i32, i32, i32
  }
  func.func @transform_1(%arg0: i32) -> (i32, i32) {
    %c0_i32 = arith.constant 0 : i32
    %c0_i32_0 = arith.constant 0 : i32
    %c0_i32_1 = arith.constant 0 : i32
    return %c0_i32, %c0_i32_0 : i32, i32
  }
  func.func @transform_2(%arg0: i32) -> (i32, i32) {
    %c0_i32 = arith.constant 0 : i32
    %c0_i32_0 = arith.constant 0 : i32
    %c0_i32_1 = arith.constant 0 : i32
    return %c0_i32, %c0_i32_0 : i32, i32
  }
  func.func @transform_3(%arg0: i32) -> (i32, i32) {
    %c0_i32 = arith.constant 0 : i32
    %c0_i32_0 = arith.constant 0 : i32
    %c0_i32_1 = arith.constant 0 : i32
    return %c0_i32, %c0_i32_0 : i32, i32
  }
  func.func @transform_4(%arg0: i32) -> (i32, i32) {
    %c0_i32 = arith.constant 0 : i32
    %c0_i32_0 = arith.constant 0 : i32
    %c0_i32_1 = arith.constant 0 : i32
    return %c0_i32, %c0_i32_0 : i32, i32
  }
  func.func @transform_5(%arg0: i32) -> (i32, i32, i32) {
    %c0_i32 = arith.constant 0 : i32
    %c0_i32_0 = arith.constant 0 : i32
    %c0_i32_1 = arith.constant 0 : i32
    return %arg0, %c0_i32, %c0_i32_0 : i32, i32, i32
  }
}

</mosaic_0001>

<bundles_post_ra>
// kernel: tpu_custom_call.1
= control target key start
LH: loop header
LB: loop body
LE: loop exit
PB: predicated region body
PF: predicated region fallthrough
CT: control target
= control target key end

     0   :  { %10 = vsyncpa [#allocation3], 0  ;;  %s450_s0 = inlined_call_operand.hbm [shape: f32[2,4,256], index: 0, kind: input, shape index: {}]   ;;  %s451_s1 = inlined_call_operand.vmem [shape: f32[4,8], index: 1, kind: input, shape index: {}]   ;;  %s452_s2 = inlined_call_operand.vmem [shape: f32[1,8], index: 2, kind: input, shape index: {}]   ;;  %s453_s3 = inlined_call_operand.vmem [shape: f32[8,4], index: 3, kind: input, shape index: {}]   ;;  %s454_s4 = inlined_call_operand.vmem [shape: f32[1,4], index: 4, kind: input, shape index: {}]   ;;  %s455_s5 = inlined_call_operand.hbm [shape: f32[2,4,256], index: 5, kind: output, shape index: {}]  }
   0x1   :  { %11 = vsyncpa [#allocation4], 0  ;;  %s361_s18 = smov [#allocation2]   ;;  %s313_s22 = scalar_lea.hbm %s450_s0, 256 }
   0x2   :  { %s17_s19 = sshll.u32 %s361_s18, 4  ;;  %p314_p0 = scmp.ne.s32.totalorder %s450_s0, %s313_s22  ;;  %s18_s19 = int_to_ptr.vmem [resolvable:$true] %s17_s19 }
   0x3   :  { %p317_p1 = scmp.lt.u32.totalorder %s313_s22, %s450_s0 }
   0x5   :  { %p319_p2 = pnand %p317_p1, %p314_p0 }
   0x7   :  { %322 = shalt.err (!%p319_p2)
}
   0x8   :  { %s323_s27 = scalar_lea.vmem %s18_s19, 256  ;;  %p328_p4 = scmp.lt.s32.totalorder %s18_s19, %s18_s19 }
   0x9   :  { %p324_p3 = scmp.ne.s32.totalorder %s18_s19, %s323_s27  ;;  %p329_p5 = scmp.lt.s32.totalorder %s323_s27, %s323_s27 }
   0xb   :  { %p330_p6 = por %p329_p5, %p328_p4 }
   0xd   :  { %p331_p7 = pnand %p330_p6, %p324_p3 }
   0xf   :  { %334 = shalt.err (!%p331_p7)
}
  0x10   :  { %s362_s28 = smov 128   ;;  %s363_s29 = smov 8  }
  0x11   :  { %23 = dma.hbm_to_vmem [thread:$0]  %s450_s0, 256, %s18_s19, [#allocation3], %s362_s28, %s362_s28, %s363_s29  }
  0x12   :  { %357 = dma.done.wait [#allocation3], 256  }
  0x13   :  { %358 = vsyncadd [#allocation3], 4294967040  ;;  %vm43_vm0 = vcmask 1043456   ;;  %v35_v0 = vld [vmem:[#allocation2] sm:$0xff]  ;;  %v412_v1 = vld [vmem:[#allocation2 + $0x8] sm:$0xff]  ;;  %v364_v11 = vmov 0.0   ;;  %v66_v12 = vlaneseq }
  0x14   :  { %v39_v2 = vcombine.high %v35_v0, %v35_v0  ;;  %v44_v3 = vsel %vm43_vm0, %v35_v0, 0.0  ;;  %v40_v4 = vcombine.high %v412_v1, %v412_v1  ;;  %v49_v6 = vsel %vm43_vm0, %v412_v1, 0.0  ;;  %v56_v10 = vld [vmem:[%s451_s1] sm:$0xf]  ;;  %295 = vmatprep.subr.mxu0 %v364_v11  ;;  %300 = vmatprep.subr.mxu1 %v364_v11 }
  0x15   :  { %vm365_vm1 = vmmov 0   ;;  %296 = vmatpush3.msk.msra.mxu0 %vm43_vm0, %v56_v10  ;;  %v67_v13 = vand.u32 127, %v66_v12  ;;  %v69_v14 = vshrl.u32 %v66_v12, 7  ;;  %vm76_vm2 = vcmask 1041409   ;;  %v155_v23 = vld [vmem:[%s453_s3] sm:$0xff] }
  0x16   :  { %v45_v5 = vsel %vm43_vm0, %v39_v2, 0.0  ;;  %v50_v7 = vsel %vm43_vm0, %v40_v4, 0.0  ;;  %297 = vmatprep.mubr.msk.f32.mxu0 %vm365_vm1, %v364_v11  ;;  %302 = vmatprep.mubr.msk.f32.mxu1 %vm365_vm1, %v364_v11  ;;  %vm78_vm3 = vcmask 31744   ;;  %v286_v24 = vld [vmem:[%s452_s2] ss:$0 sm:$0xff]  ;;  %vm163_vm4 = vcmask 64512  }
  0x17   :  { %v46_v8 = vadd.f32 %v45_v5, %v44_v3  ;;  %v51_v9 = vadd.f32 %v50_v7, %v49_v6  ;;  %v70_v16 = vsub.s32 %v67_v13, %v69_v14  ;;  %301 = vmatpush3.msra.mxu1 %v155_v23  ;;  %v289_v29 = vld [vmem:[%s454_s4] ss:$0 sm:$0xff]  ;;  %v243_v36 = vsub.s32 0, %v69_v14  ;;  %s366_s2 = smov [#allocation5]  }
  0x18   :  { %v250_v39 = vsub.s32 1, %v69_v14  ;;  %s274_s3 = sshll.u32 %s366_s2, 4  ;;  %s275_s3 = int_to_ptr.vmem [resolvable:$true] %s274_s3 }
  0x19   :  { %47 = vadd.xlane.f32.xlu0 %v46_v8  ;;  %s335_s4 = scalar_lea.vmem %s275_s3, 256  ;;  %p340_p9 = scmp.lt.s32.totalorder %s275_s3, %s275_s3 }
  0x1a   :  { %p336_p8 = scmp.ne.s32.totalorder %s275_s3, %s335_s4  ;;  %p341_p10 = scmp.lt.s32.totalorder %s335_s4, %s335_s4 }
  0x1c   :  { %p342_p11 = por %p341_p10, %p340_p9 }
  0x1d   :  { %52 = vadd.xlane.f32.xlu0 %v51_v9 }
  0x1e   :  { %p343_p12 = pnand %p342_p11, %p336_p8 }
  0xa6   :  { %v48_v15 = vpop.xlane.xlu0 %47 }
  0xa7   :  { %v54_v17 = vmul.f32 0.00390625, %v48_v15 }
  0xa9   :  { %v71_v20 = vrot.slane %v54_v17, %v70_v16 }
  0xaa   :  { %v53_v18 = vpop.xlane.xlu0 %52 }
  0xab   :  { %v55_v19 = vmul.f32 0.00390625, %v53_v18 }
  0xad   :  { %v75_v21 = vrot.slane %v55_v19, %v70_v16 }
  0xaf   :  { %v77_v22 = vsel %vm76_vm2, %v75_v21, %v71_v20 }
  0xb0   :  { %298 = vmatmul.mubr.msk.f32.vlgmr.msra.gmra.mrb[0].mxu0 %vm78_vm3, %v77_v22 }
 0x183   :  { %v150_v25 = vpop.f32.mrb[0].mxu0 }
 0x184   :  { %v151_v26 = vadd.f32 %v286_v24, %v150_v25  ;;  %v299_v27 = vpop.f32.mrb[1].mxu0 }
 0x186   :  { %v154_v28 = vmax.f32 %v151_v26, 0.0 }
 0x188   :  { %303 = vmatmul.mubr.msk.f32.vlgmr.msra.gmra.mrb[0].mxu1 %vm163_vm4, %v154_v28 }
 0x25b   :  { %v233_v30 = vpop.f32.mrb[0].mxu1 }
 0x25c   :  { %v234_v31 = vadd.f32 %v289_v29, %v233_v30  ;;  %v304_v32 = vpop.f32.mrb[1].mxu1 }
 0x25e   :  { %v237_v33 = vadd.f32 3.0, %v234_v31 }
 0x260   :  { %v238_v34 = vmax.f32 %v237_v33, 0.0 }
 0x262   :  { %v239_v35 = vmin.f32 %v238_v34, 6.0 }
 0x264   :  { %v240_v37 = vmul.f32 0.16666667, %v239_v35 }
 0x266   :  { %v244_v38 = vrot.slane %v240_v37, %v243_v36  ;;  %v251_v40 = vrot.slane %v240_v37, %v250_v39 }
 0x268   :  { %246 = vbcast.lane.b32.xlu1 %v244_v38, 256 }
 0x26c   :  { %253 = vbcast.lane.b32.xlu1 %v251_v40, 256 }
 0x2da   :  { %v247_v41 = vpop.permute.xlu1 %246 }
 0x2db   :  { %v255_v42 = vmul.f32 %v247_v41, %v35_v0  ;;  %v256_v43 = vmul.f32 %v247_v41, %v39_v2 }
 0x2dd   :  { %v263_v44 = vcombine.low %v255_v42, %v256_v43 }
 0x2de   :  { %v254_v45 = vpop.permute.xlu1 %253 }
 0x2df   :  { %267 = vst [vmem:[#allocation5] sm:$0xff] %v263_v44  ;;  %v257_v46 = vmul.f32 %v254_v45, %v412_v1  ;;  %v258_v47 = vmul.f32 %v254_v45, %v40_v4 }
 0x2e1   :  { %v264_v48 = vcombine.low %v257_v46, %v258_v47 }
 0x2e3   :  { %268 = vst [vmem:[#allocation5 + $0x8] sm:$0xff] %v264_v48 }
 0x2e4   :  { %346 = shalt.err (!%p343_p12)
}
 0x2e5   :  { %s347_s15 = scalar_lea.hbm %s455_s5, 256 }
 0x2e6   :  { %p348_p13 = scmp.ne.s32.totalorder %s455_s5, %s347_s15  ;;  %p351_p0 = scmp.lt.u32.totalorder %s347_s15, %s455_s5 }
 0x2e8   :  { %p353_p1 = pnand %p351_p0, %p348_p13 }
 0x2ea   :  { %356 = shalt.err (!%p353_p1)
}
 0x2eb   :  { %280 = dma.vmem_to_hbm [thread:$0]  %s275_s3, 256, %s455_s5, [#allocation4], %s362_s28, %s362_s28, %s363_s29  }
 0x2ec   :  { %359 = dma.done.wait [#allocation4], 256  }
 0x2ed   :  { %360 = vsyncadd [#allocation4], 4294967040 }
 0x2ee   :  { %284 = vsyncpa [#allocation3], 1 }
 0x2ef   :  { %285 = vsyncpa [#allocation4], 1 }

</bundles_post_ra>
